<compile_context>
chip_gen: v6e
topology: v6e:2x2x1
jax: 0.10.0
libtpu: 0.0.40
codegen_flags: <defaults>
</compile_context>

<pallas_src>
import functools

import jax
import jax.numpy as jnp
from jax.experimental import pallas as pl
from jax.experimental.pallas import tpu as pltpu

_LANES = 128
_SUBLANES = 8


def _round_up(x, m):
    return ((x + m - 1) // m) * m


def _focal_loss_kernel(pred_ref, tgt_ref, alpha_ref, out_ref, *,
                       gamma, use_alpha, n_total, mask_tail):
    # pred_ref:  (C, T) logits tile, batch on the 128-wide lane axis.
    # tgt_ref:   (1, T) int32 class indices (precondition: 0 <= target < C,
    #            like torch scatter_ would require).
    # alpha_ref: (C, 1) f32 per-class weights.
    # out_ref:   (1, 8, 128) per-tile partial loss sum (value broadcast).
    logits = pred_ref[...].astype(jnp.float32)                    # (C, T)
    c, t = logits.shape
    tgt = tgt_ref[...]                                             # (1, T)

    # one-hot(target) along the class (sublane) axis (replaces torch scatter_).
    class_ids = jax.lax.broadcasted_iota(jnp.int32, (c, t), 0)
    onehot = class_ids == tgt                                      # (C, T)

    # Numerically stable softmax over classes; only the target-class
    # probability is carried forward so log/pow/divide run on (1, T).
    m = jnp.max(logits, axis=0, keepdims=True)                     # (1, T)
    e = jnp.exp(logits - m)                                         # (C, T)
    sum_e = jnp.sum(e, axis=0, keepdims=True)                       # (1, T)
    e_t = jnp.sum(jnp.where(onehot, e, 0.0), axis=0, keepdims=True)  # (1, T)

    # Divide via the EUP approximate reciprocal, refined with one Newton step
    # to ~f32 accuracy.  Keeps the VPU slot free (matters most on v7x).
    r = pl.reciprocal(sum_e, approx=True)
    r = r * (2.0 - sum_e * r)
    p_t = e_t * r
    # prob.clamp(min=0.0001, max=1.0): the upper clamp is a no-op for softmax.
    p_t = jnp.maximum(p_t, 0.0001)

    # (1 - p)^gamma via exponentiation-by-squaring for integer gamma
    # (gamma=2 -> a single multiply), avoiding pow = exp(g*log(x)).
    q = 1.0 - p_t
    g = float(gamma)
    if g == int(g) and 0 <= int(g) <= 64:
        k = int(g)
        if k == 0:
            w = jnp.ones_like(q)
        else:
            w, base = None, q
            while k:
                if k & 1:
                    w = base if w is None else w * base
                k >>= 1
                if k:
                    base = base * base
    else:
        w = jnp.power(q, g)

    # TODO(synk): reference upcasts to float64; TPU has no f64 so the focal
    # term stays in float32 (same math, lower precision).
    loss = -w * jnp.log(p_t)                                        # (1, T)
    if use_alpha:
        alpha_t = jnp.sum(jnp.where(onehot, alpha_ref[...], 0.0),
                          axis=0, keepdims=True)                    # alpha[tgt]
        loss = alpha_t * loss

    if mask_tail:   # static (trace-time) flag: batch does not divide the tile
        col = jax.lax.broadcasted_iota(jnp.int32, (1, t), 1)
        valid = (pl.program_id(0) * t + col) < n_total
        loss = jnp.where(valid, loss, 0.0)

    out_ref[...] = jnp.broadcast_to(jnp.sum(loss), (1, _SUBLANES, _LANES))


def focal_loss(pred, target, *, class_num, alpha=None, gamma=2,
               use_alpha=False, size_average=True, max_tile_n=65536):
    """pred: (..., class_num) float logits; target: (...,) int class indices."""
    pred2d = jnp.reshape(pred, (-1, class_num))     # keep dtype; cast in VMEM
    n, c = pred2d.shape

    # Lane-dense layout: classes on sublanes, batch on the 128-wide lane axis.
    # This transpose is the single extra HBM pass over pred.
    pred_t = pred2d.T                                               # (C, N)
    tgt = jnp.reshape(target, (1, -1)).astype(jnp.int32)            # (1, N)

    # Tile the batch axis.  Budget the double-buffered input blocks to ~6 MiB
    # so blocks + in-kernel (C, T) temporaries stay well under the 32 MiB
    # scoped-VMEM limit on every generation (v7x: 64 MiB physical per TC).
    itemsize = jnp.dtype(pred_t.dtype).itemsize
    block_budget = 6 * 1024 * 1024
    per_col = 2 * (c * itemsize + 4)                # 2x (pred col + tgt col)
    cap = max(_LANES, (block_budget // per_col) // _LANES * _LANES)
    tile_n = min(max_tile_n, cap, _round_up(n, _LANES))
    if n > _LANES:                       # keep >= 2 tiles for v7x's 2 TCs
        tile_n = min(tile_n, _round_up(pl.cdiv(n, 2), _LANES))
    tile_n = max(_LANES, _round_up(tile_n, _LANES))
    num_tiles = pl.cdiv(n, tile_n)

    # Only a sub-tile-sized batch is ever padded (negligible cost); larger
    # batches stream unpadded and the ragged tail is masked in-kernel.
    if n < tile_n:
        pred_t = jnp.pad(pred_t, ((0, 0), (0, tile_n - n)))
        tgt = jnp.pad(tgt, ((0, 0), (0, tile_n - n)))

    if use_alpha:
        alpha_arr = jnp.asarray(alpha, dtype=jnp.float32).reshape(c, 1)
    else:
        alpha_arr = jnp.ones((c, 1), dtype=jnp.float32)

    kernel = functools.partial(
        _focal_loss_kernel, gamma=gamma, use_alpha=use_alpha,
        n_total=n, mask_tail=(n % tile_n != 0))

    cost = pl.CostEstimate(
        flops=8 * n * c,
        transcendentals=n * c + 2 * n,
        bytes_accessed=n * c * itemsize + n * 4
                       + num_tiles * _SUBLANES * _LANES * 4 + c * 4)

    partials = pl.pallas_call(
        kernel,
        out_shape=jax.ShapeDtypeStruct((num_tiles, _SUBLANES, _LANES),
                                       jnp.float32),
        grid=(num_tiles,),
        in_specs=[
            pl.BlockSpec((c, tile_n), lambda i: (0, i)),    # pred (C, TILE_N)
            pl.BlockSpec((1, tile_n), lambda i: (0, i)),    # target (1, TILE_N)
            pl.BlockSpec((c, 1), lambda i: (0, 0)),         # alpha (untiled)
        ],
        out_specs=pl.BlockSpec((1, _SUBLANES, _LANES), lambda i: (i, 0, 0)),
        compiler_params=pltpu.CompilerParams(
            dimension_semantics=("parallel",),              # v7x 2-TC shardable
            vmem_limit_bytes=32 * 1024 * 1024),
        cost_estimate=cost,
    )(pred_t, tgt, alpha_arr)

    total = jnp.sum(partials[:, 0, 0])
    if size_average:
        total = total / jnp.float32(n)
    return total


def _focal_loss_ref(pred, target, *, class_num, alpha=None, gamma=2,
                    use_alpha=False, size_average=True):
    """Pure-JAX reference mirroring the PyTorch forward (in f32)."""
    pred2d = jnp.reshape(pred, (-1, class_num)).astype(jnp.float32)
    prob = jax.nn.softmax(pred2d, axis=1)
    prob = jnp.clip(prob, 0.0001, 1.0)
    onehot = jax.nn.one_hot(jnp.reshape(target, (-1,)), class_num,
                            dtype=jnp.float32)
    loss = -jnp.power(1.0 - prob, float(gamma)) * jnp.log(prob) * onehot
    if use_alpha:
        loss = jnp.asarray(alpha, jnp.float32)[None, :] * loss
    loss = jnp.sum(loss, axis=1)
    return jnp.mean(loss) if size_average else jnp.sum(loss)


if __name__ == "__main__":
    class_num = 8
    batch = 16

    key = jax.random.PRNGKey(0)
    k_pred, k_tgt = jax.random.split(key)
    pred = jax.random.normal(k_pred, (batch, class_num), dtype=jnp.float32)
    target = jax.random.randint(k_tgt, (batch,), 0, class_num, dtype=jnp.int32)

    # default config: use_alpha=False, gamma=2, size_average=True
    loss = focal_loss(pred, target, class_num=class_num, gamma=2,
                      use_alpha=False, size_average=True)
    loss = jax.block_until_ready(loss)
    ref = _focal_loss_ref(pred, target, class_num=class_num, gamma=2,
                          use_alpha=False, size_average=True)
    assert jnp.allclose(loss, ref, rtol=1e-4, atol=1e-6), (loss, ref)

    # also exercise the use_alpha branch (sum reduction)
    alpha = [0.1 + 0.05 * i for i in range(class_num)]
    loss_a = focal_loss(pred, target, class_num=class_num, alpha=alpha,
                        gamma=2, use_alpha=True, size_average=False)
    loss_a = jax.block_until_ready(loss_a)
    ref_a = _focal_loss_ref(pred, target, class_num=class_num, alpha=alpha,
                            gamma=2, use_alpha=True, size_average=False)
    assert jnp.allclose(loss_a, ref_a, rtol=1e-4, atol=1e-6), (loss_a, ref_a)

    print("KERNEL_OK")
</pallas_src>

<mosaic_0001>
module attributes {stable_mosaic.version = 11 : i64} {
  func.func @_focal_loss_kernel(%arg0: i32, %arg1: memref<8x128xf32, #tpu.memory_space<vmem>>, %arg2: memref<1x128xi32, #tpu.memory_space<vmem>>, %arg3: memref<8x1xf32, #tpu.memory_space<vmem>>, %arg4: memref<1x8x128xf32, #tpu.memory_space<vmem>>) attributes {dimension_semantics = [#tpu.dimension_semantics<parallel>], iteration_bounds = array<i64: 1>, scalar_prefetch = 0 : i64, scratch_operands = 0 : i64, tpu.core_type = #tpu.core_type<tc>, window_params = [{transform_indices = @transform_0, window_bounds = array<i64: 8, 128>}, {transform_indices = @transform_1, window_bounds = array<i64: 1, 128>}, {pipeline_mode = #tpu.pipeline_mode<synchronous>, transform_indices = @transform_2, window_bounds = array<i64: 8, 1>}, {transform_indices = @transform_3, window_bounds = array<i64: 1, 8, 128>}]} {
    %c0 = arith.constant 0 : index
    %c0_0 = arith.constant 0 : index
    %0 = vector.load %arg1[%c0, %c0_0] : memref<8x128xf32, #tpu.memory_space<vmem>>, vector<8x128xf32>
    %c0_1 = arith.constant 0 : index
    %c0_2 = arith.constant 0 : index
    %1 = vector.load %arg2[%c0_1, %c0_2] : memref<1x128xi32, #tpu.memory_space<vmem>>, vector<1x128xi32>
    %2 = tpu.iota {dimensions = array<i32: 0>} : vector<8x128xi32>
    %3 = vector.broadcast %1 : vector<1x128xi32> to vector<8x128xi32>
    %4 = arith.cmpi eq, %2, %3 : vector<8x128xi32>
    %cst = arith.constant dense<0xFF800000> : vector<128xf32>
    %5 = vector.multi_reduction <maximumf>, %0, %cst [0] : vector<8x128xf32> to vector<128xf32>
    %6 = vector.shape_cast %5 : vector<128xf32> to vector<1x128xf32>
    %7 = vector.broadcast %6 : vector<1x128xf32> to vector<8x128xf32>
    %8 = arith.subf %0, %7 : vector<8x128xf32>
    %9 = math.exp %8 : vector<8x128xf32>
    %cst_3 = arith.constant dense<0.000000e+00> : vector<128xf32>
    %10 = vector.multi_reduction <add>, %9, %cst_3 [0] : vector<8x128xf32> to vector<128xf32>
    %11 = vector.shape_cast %10 : vector<128xf32> to vector<1x128xf32>
    %cst_4 = arith.constant 0.000000e+00 : f32
    %12 = vector.broadcast %cst_4 : f32 to vector<8x128xf32>
    %13 = arith.select %4, %9, %12 : vector<8x128xi1>, vector<8x128xf32>
    %cst_5 = arith.constant dense<0.000000e+00> : vector<128xf32>
    %14 = vector.multi_reduction <add>, %13, %cst_5 [0] : vector<8x128xf32> to vector<128xf32>
    %15 = vector.shape_cast %14 : vector<128xf32> to vector<1x128xf32>
    %16 = tpu.reciprocal %11 {approx = true} : vector<1x128xf32> -> vector<1x128xf32>
    %17 = arith.mulf %11, %16 : vector<1x128xf32>
    %cst_6 = arith.constant 2.000000e+00 : f32
    %18 = vector.broadcast %cst_6 : f32 to vector<1x128xf32>
    %19 = arith.subf %18, %17 : vector<1x128xf32>
    %20 = arith.mulf %16, %19 : vector<1x128xf32>
    %21 = arith.mulf %15, %20 : vector<1x128xf32>
    %cst_7 = arith.constant 9.99999974E-5 : f32
    %22 = vector.broadcast %cst_7 : f32 to vector<1x128xf32>
    %23 = arith.maximumf %21, %22 : vector<1x128xf32>
    %cst_8 = arith.constant 1.000000e+00 : f32
    %24 = vector.broadcast %cst_8 : f32 to vector<1x128xf32>
    %25 = arith.subf %24, %23 : vector<1x128xf32>
    %26 = arith.mulf %25, %25 : vector<1x128xf32>
    %cst_9 = arith.constant 0.000000e+00 : f32
    %27 = vector.broadcast %cst_9 : f32 to vector<1x128xf32>
    %28 = arith.subf %27, %26 : vector<1x128xf32>
    %29 = math.log %23 : vector<1x128xf32>
    %30 = arith.mulf %28, %29 : vector<1x128xf32>
    %31 = tpu.iota {dimensions = array<i32: 1>} : vector<1x128xi32>
    %c128_i32 = arith.constant 128 : i32
    %32 = arith.muli %arg0, %c128_i32 : i32
    %33 = vector.broadcast %32 : i32 to vector<1x128xi32>
    %34 = arith.addi %33, %31 : vector<1x128xi32>
    %c16_i32 = arith.constant 16 : i32
    %35 = vector.broadcast %c16_i32 : i32 to vector<1x128xi32>
    %36 = arith.cmpi slt, %34, %35 : vector<1x128xi32>
    %cst_10 = arith.constant 0.000000e+00 : f32
    %37 = vector.broadcast %cst_10 : f32 to vector<1x128xf32>
    %38 = arith.select %36, %30, %37 : vector<1x128xi1>, vector<1x128xf32>
    %39 = vector.shape_cast %38 : vector<1x128xf32> to vector<1x1x128xf32>
    %cst_11 = arith.constant dense<0.000000e+00> : vector<1xf32>
    %40 = vector.multi_reduction <add>, %39, %cst_11 [1, 2] : vector<1x1x128xf32> to vector<1xf32>
    %41 = vector.shape_cast %40 : vector<1xf32> to vector<1x1x1xf32>
    %42 = vector.extract %41[0, 0, 0] : f32 from vector<1x1x1xf32>
    %43 = vector.broadcast %42 : f32 to vector<1x8x128xf32>
    %c0_12 = arith.constant 0 : index
    %c0_13 = arith.constant 0 : index
    %c0_14 = arith.constant 0 : index
    %44 = vector.load %arg4[%c0_12, %c0_13, %c0_14] : memref<1x8x128xf32, #tpu.memory_space<vmem>>, vector<1x8x128xf32>
    tpu.vector_store %arg4[%c0_12, %c0_13, %c0_14], %43 {strides = array<i32>} : memref<1x8x128xf32, #tpu.memory_space<vmem>>, vector<1x8x128xf32>,
    return
  }
  func.func @transform_0(%arg0: i32) -> (i32, i32) {
    %c0_i32 = arith.constant 0 : i32
    %c0_i32_0 = arith.constant 0 : i32
    return %c0_i32, %arg0 : i32, i32
  }
  func.func @transform_1(%arg0: i32) -> (i32, i32) {
    %c0_i32 = arith.constant 0 : i32
    %c0_i32_0 = arith.constant 0 : i32
    return %c0_i32, %arg0 : i32, i32
  }
  func.func @transform_2(%arg0: i32) -> (i32, i32) {
    %c0_i32 = arith.constant 0 : i32
    %c0_i32_0 = arith.constant 0 : i32
    %c0_i32_1 = arith.constant 0 : i32
    return %c0_i32, %c0_i32_0 : i32, i32
  }
  func.func @transform_3(%arg0: i32) -> (i32, i32, i32) {
    %c0_i32 = arith.constant 0 : i32
    %c0_i32_0 = arith.constant 0 : i32
    %c0_i32_1 = arith.constant 0 : i32
    return %arg0, %c0_i32, %c0_i32_0 : i32, i32, i32
  }
}

</mosaic_0001>

<bundles_post_ra>
// kernel: tpu_custom_call.1
= control target key start
LH: loop header
LB: loop body
LE: loop exit
PB: predicated region body
PF: predicated region fallthrough
CT: control target
= control target key end

     0   :  { %s154_s0 = inlined_call_operand.vmem [shape: f32[8,128], index: 0, kind: input, shape index: {}]   ;;  %s155_s1 = inlined_call_operand.vmem [shape: s32[1,128], index: 1, kind: input, shape index: {}]   ;;  %s156_s2 = inlined_call_operand.vmem [shape: f32[8,1], index: 2, kind: input, shape index: {}]   ;;  %s157_s3 = inlined_call_operand.hbm [shape: f32[1,8,128], index: 3, kind: output, shape index: {}]  }
   0x1   :  { %v15_v0 = vld [vmem:[%s154_s0] sm:$0xff] }
   0x2   :  { %8 = vsyncpa [#allocation3], 0  ;;  %v24_v1 = vrot.slane %v15_v0, 4  ;;  %v17_v9 = vlaneseq  ;;  %v92_v12 = vld [vmem:[%s155_s1] ss:$0 sm:$0xff]  ;;  %vm65_vm2 = vcmask 1040384  }
   0x3   :  { %s124_s0 = smov [#allocation2]  }
   0x4   :  { %v25_v2 = vmax.f32 %v15_v0, %v24_v1  ;;  %v18_v10 = vshrl.u32 %v17_v9, 7  ;;  %v59_v34 = vand.u32 127, %v17_v9  ;;  %s84_s1 = sshll.u32 %s124_s0, 4  ;;  %s85_s1 = int_to_ptr.vmem [resolvable:$true] %s84_s1 }
   0x5   :  { %s102_s16 = scalar_lea.vmem %s85_s1, 128  ;;  %p107_p1 = scmp.lt.s32.totalorder %s85_s1, %s85_s1 }
   0x6   :  { %v26_v3 = vrot.slane %v25_v2, 2  ;;  %vm23_vm0 = vcmp.eq.s32.totalorder %v18_v10, %v92_v12  ;;  %vm63_vm1 = vcmp.lt.s32.totalorder %v59_v34, 16  ;;  %p103_p0 = scmp.ne.s32.totalorder %s85_s1, %s102_s16  ;;  %p108_p2 = scmp.lt.s32.totalorder %s102_s16, %s102_s16 }
   0x8   :  { %v27_v4 = vmax.f32 %v25_v2, %v26_v3  ;;  %p109_p3 = por %p108_p2, %p107_p1 }
   0xa   :  { %v28_v5 = vrot.slane %v27_v4, 1  ;;  %p110_p4 = pnand %p109_p3, %p103_p0 }
   0xc   :  { %v29_v6 = vmax.f32 %v27_v4, %v28_v5 }
   0xe   :  { %v30_v7 = vsub.f32 %v15_v0, %v29_v6 }
  0x10   :  { %v31_v8 = vmul.f32 1.442695, %v30_v7 }
  0x12   :  { %96 = vpow2.f32 %v31_v8 }
  0x1f   :  { %v97_v11 = vpop.eup %96 }
  0x20   :  { %v33_v13 = vrot.slane %v97_v11, 4  ;;  %v39_v16 = vsel %vm23_vm0, %v97_v11, 0.0 }
  0x21   :  { %v40_v19 = vrot.slane %v39_v16, 4 }
  0x22   :  { %v34_v14 = vadd.f32 %v97_v11, %v33_v13 }
  0x23   :  { %v41_v21 = vadd.f32 %v40_v19, %v39_v16 }
  0x24   :  { %v35_v15 = vrot.slane %v34_v14, 2 }
  0x25   :  { %v42_v22 = vrot.slane %v41_v21, 2 }
  0x26   :  { %v36_v17 = vadd.f32 %v35_v15, %v34_v14 }
  0x27   :  { %v43_v23 = vadd.f32 %v42_v22, %v41_v21 }
  0x28   :  { %v37_v18 = vrot.slane %v36_v17, 1 }
  0x29   :  { %v44_v24 = vrot.slane %v43_v23, 1 }
  0x2a   :  { %v38_v20 = vadd.f32 %v37_v18, %v36_v17 }
  0x2b   :  { %v45_v27 = vadd.f32 %v44_v24, %v43_v23 }
  0x2c   :  { %98 = vrcp.f32 %v38_v20 }
  0x39   :  { %v99_v25 = vpop.eup %98 }
  0x3a   :  { %v47_v26 = vmul.f32 %v99_v25, %v38_v20 }
  0x3c   :  { %v48_v28 = vsub.f32 2.0, %v47_v26 }
  0x3e   :  { %v49_v29 = vmul.f32 %v99_v25, %v48_v28 }
  0x40   :  { %v50_v30 = vmul.f32 %v49_v29, %v45_v27 }
  0x42   :  { %v51_v31 = vmax.f32 %v50_v30, 0.0001 }
  0x44   :  { %100 = vlog2.f32 %v51_v31  ;;  %v52_v32 = vsub.f32 1.0, %v51_v31 }
  0x46   :  { %v53_v33 = vmul.f32 %v52_v32, %v52_v32 }
  0x48   :  { %v54_v35 = vsub.f32 0.0, %v53_v33 }
  0x51   :  { %v101_v36 = vpop.eup %100 }
  0x52   :  { %v56_v37 = vmul.f32 0.6931472, %v101_v36 }
  0x54   :  { %v57_v38 = vmul.f32 %v56_v37, %v54_v35 }
  0x56   :  { %v64_v39 = vsel %vm63_vm1, %v57_v38, 0.0 }
  0x57   :  { %v66_v40 = vsel %vm65_vm2, %v64_v39, 0.0 }
  0x58   :  { %67 = vadd.xlane.f32.xlu0 %v66_v40 }
  0xe1   :  { %v68_v41 = vpop.xlane.xlu0 %67 }
  0xe2   :  { %v69_v42 = vrot.slane %v68_v41, 4 }
  0xe4   :  { %v70_v43 = vadd.f32 %v69_v42, %v68_v41 }
  0xe6   :  { %v71_v44 = vrot.slane %v70_v43, 2 }
  0xe8   :  { %v72_v45 = vadd.f32 %v71_v44, %v70_v43 }
  0xea   :  { %v73_v46 = vrot.slane %v72_v45, 1 }
  0xec   :  { %v74_v47 = vadd.f32 %v73_v46, %v72_v45 }
  0xee   :  { %93 = vpush %v74_v47 }
 0x11f   :  { %s94_s15 = spop %93 }
 0x120   :  { %v76_v48 = vstv %s94_s15 }
 0x121   :  { %77 = vst [vmem:[#allocation2] sm:$0xff] %v76_v48 }
 0x122   :  { %113 = shalt.err (!%p110_p4)
}
 0x123   :  { %87 = dma.vmem_to_hbm [thread:$0]  %s85_s1, 128, %s157_s3, [#allocation3]  }
 0x124   :  { %122 = dma.done.wait [#allocation3], 128  }
 0x125   :  { %123 = vsyncadd [#allocation3], 4294967168 }
 0x126   :  { %91 = vsyncpa [#allocation3], 1 }

</bundles_post_ra>
